<compile_context>
chip_gen: v7x
topology: tpu7x:2x2x1
jax: 0.10.0
libtpu: 0.0.40
codegen_flags: <defaults>
</compile_context>

<pallas_src>
import jax
import jax.numpy as jnp
from jax.experimental import pallas as pl
from jax.experimental.pallas import tpu as pltpu

BN_EPS = 1e-5


def _round_up(a, b):
    return ((a + b - 1) // b) * b


# ----------------------------- Pallas kernels -----------------------------

def _conv_stats_kernel(p_ref, w_ref, conv_ref, sum_ref, ssq_ref):
    # bf16 x bf16 -> f32 accumulation on the MXU; store conv tile + per-tile stats.
    acc = jnp.dot(p_ref[...], w_ref[...], preferred_element_type=jnp.float32)
    conv_ref[...] = acc.astype(conv_ref.dtype)
    # Per-channel partial sums live in the DMA/MXU slack (kept in-kernel per review).
    sum_ref[...] = jnp.sum(acc, axis=0)[None, None, :]
    ssq_ref[...] = jnp.sum(acc * acc, axis=0)[None, None, :]


def _stats_only_kernel(p_ref, w_ref, sum_ref, ssq_ref):
    # Matmul used only for BN statistics; conv is recomputed (fused) in pass 2.
    acc = jnp.dot(p_ref[...], w_ref[...], preferred_element_type=jnp.float32)
    sum_ref[...] = jnp.sum(acc, axis=0)[None, None, :]
    ssq_ref[...] = jnp.sum(acc * acc, axis=0)[None, None, :]


def _bn_silu_kernel(conv_ref, scale_ref, shift_ref, o_ref):
    # Folded BN affine + SiLU; exp and approx reciprocal run on the EUP.
    y = conv_ref[...].astype(jnp.float32) * scale_ref[...] + shift_ref[...]
    sig = pl.reciprocal(1.0 + jnp.exp(-y), approx=True)
    o_ref[...] = (y * sig).astype(o_ref.dtype)


def _fused_conv_bn_silu_kernel(p_ref, w_ref, scale_ref, shift_ref, o_ref):
    # Recompute conv on the MXU and apply BN+SiLU in one pass (no conv HBM traffic).
    acc = jnp.dot(p_ref[...], w_ref[...], preferred_element_type=jnp.float32)
    y = acc * scale_ref[...] + shift_ref[...]
    sig = pl.reciprocal(1.0 + jnp.exp(-y), approx=True)
    o_ref[...] = (y * sig).astype(o_ref.dtype)


# ----------------------------- host-side helpers -----------------------------

def _im2col_bf16(x_nchw, k, stride, padding):
    """bf16 conv patches, feature order (ky, kx, cin) — matches the reordered weight."""
    N, C, H, W = x_nchw.shape
    x = jnp.transpose(x_nchw, (0, 2, 3, 1)).astype(jnp.bfloat16)        # NHWC bf16
    xp = jnp.pad(x, ((0, 0), (padding, padding), (padding, padding), (0, 0)))
    OH = (H + 2 * padding - k) // stride + 1
    OW = (W + 2 * padding - k) // stride + 1
    cols = []
    for ky in range(k):
        for kx in range(k):
            cols.append(xp[:, ky:ky + stride * OH:stride, kx:kx + stride * OW:stride, :])
    patches = jnp.concatenate(cols, axis=-1)                            # (N,OH,OW,K*K*C)
    return patches.reshape(N * OH * OW, k * k * C), OH, OW


def cbs_forward(x_nchw, weight, bias, gamma, beta, stride, padding,
                *, tm=1024, out_dtype=jnp.float32):
    """CBS forward. `tm` = desired rows per M-tile for the matmul pass."""
    # Conv bias cancels exactly under training-mode BN (mean subtraction); drop it.
    del bias

    N, Cin, H, W = x_nchw.shape
    Cout, _, K, _ = weight.shape

    patches, OH, OW = _im2col_bf16(x_nchw, K, stride, padding)
    M, Kdim = patches.shape

    Kp = max(128, _round_up(Kdim, 128))
    Cp = max(128, _round_up(Cout, 128))

    # Weight is index-invariant; single-buffer it when large (v7x 64 MiB guard).
    w_block_bytes = Kp * Cp * 2
    single_buffer_w = w_block_bytes >= 8 * 1024 * 1024
    w_bufs = 1 if single_buffer_w else 2

    # VMEM-aware M-tile cap: double-buffered bf16 (tm,Kp)+(tm,Cp) blocks + weight.
    budget = 24 * 1024 * 1024
    per_row = 4 * (Kp + Cp)
    tm_cap = max(16, ((budget - w_bufs * w_block_bytes) // per_row) // 16 * 16)
    tm = max(16, (tm // 16) * 16)
    tm = min(tm, tm_cap, _round_up(M, 16))
    if pl.cdiv(M, tm) < 2 and M > 16:
        # Keep >=2 grid steps so both v7x TensorCores get work on small layers.
        tm = _round_up(pl.cdiv(M, 2), 16)
    Mp = _round_up(M, tm)
    num_tiles = Mp // tm

    # bf16 MXU operands; padded rows/cols are zero (contribute nothing to stats).
    p = jnp.pad(patches, ((0, Mp - M), (0, Kp - Kdim)))
    w = jnp.pad(
        jnp.transpose(weight, (2, 3, 1, 0)).reshape(Kdim, Cout).astype(jnp.bfloat16),
        ((0, Kp - Kdim), (0, Cp - Cout)))

    if single_buffer_w:
        w_spec = pl.BlockSpec((Kp, Cp), lambda i: (0, 0), pipeline_mode=pl.Buffered(1))
    else:
        w_spec = pl.BlockSpec((Kp, Cp), lambda i: (0, 0))

    cparams = pltpu.CompilerParams(
        dimension_semantics=("parallel",),      # megacore-shardable M axis
        vmem_limit_bytes=64 * 1024 * 1024,      # tiles are budget-capped well below this
    )

    fuse = Kp < 2 * Cp   # early/mid layers: recomputing the matmul is cheaper than
                         # writing + re-reading the (Mp, Cp) conv intermediate.

    if fuse:
        # ---- Pass 1: statistics only (no conv store) ----
        psum, pssq = pl.pallas_call(
            _stats_only_kernel,
            out_shape=(
                jax.ShapeDtypeStruct((num_tiles, 1, Cp), jnp.float32),
                jax.ShapeDtypeStruct((num_tiles, 1, Cp), jnp.float32),
            ),
            grid=(num_tiles,),
            in_specs=[pl.BlockSpec((tm, Kp), lambda i: (i, 0)), w_spec],
            out_specs=(
                pl.BlockSpec((1, 1, Cp), lambda i: (i, 0, 0)),
                pl.BlockSpec((1, 1, Cp), lambda i: (i, 0, 0)),
            ),
            compiler_params=cparams,
            cost_estimate=pl.CostEstimate(
                flops=2 * Mp * Kp * Cp, transcendentals=0,
                bytes_accessed=Mp * Kp * 2 + Kp * Cp * 2 + 2 * num_tiles * Cp * 4),
        )(p, w)
    else:
        # ---- Pass 1: conv matmul (bf16 store) + statistics ----
        conv, psum, pssq = pl.pallas_call(
            _conv_stats_kernel,
            out_shape=(
                jax.ShapeDtypeStruct((Mp, Cp), jnp.bfloat16),
                jax.ShapeDtypeStruct((num_tiles, 1, Cp), jnp.float32),
                jax.ShapeDtypeStruct((num_tiles, 1, Cp), jnp.float32),
            ),
            grid=(num_tiles,),
            in_specs=[pl.BlockSpec((tm, Kp), lambda i: (i, 0)), w_spec],
            out_specs=(
                pl.BlockSpec((tm, Cp), lambda i: (i, 0)),
                pl.BlockSpec((1, 1, Cp), lambda i: (i, 0, 0)),
                pl.BlockSpec((1, 1, Cp), lambda i: (i, 0, 0)),
            ),
            compiler_params=cparams,
            cost_estimate=pl.CostEstimate(
                flops=2 * Mp * Kp * Cp, transcendentals=0,
                bytes_accessed=(Mp * Kp * 2 + Kp * Cp * 2 + Mp * Cp * 2
                                + 2 * num_tiles * Cp * 4)),
        )(p, w)

    # Tiny host-side reduction of per-tile partials; divide by the TRUE M (padded
    # patch rows are zero and contribute nothing), then fold BN into scale/shift.
    total = jnp.sum(psum[:, 0, :], axis=0)
    total_sq = jnp.sum(pssq[:, 0, :], axis=0)
    mean = total / M
    var = jnp.maximum(total_sq / M - mean * mean, 0.0)
    g = jnp.pad(gamma.astype(jnp.float32), (0, Cp - Cout))
    bt = jnp.pad(beta.astype(jnp.float32), (0, Cp - Cout))
    scale = g * jax.lax.rsqrt(var + BN_EPS)
    shift = bt - mean * scale
    scale = scale.reshape(1, Cp)
    shift = shift.reshape(1, Cp)

    if fuse:
        # ---- Pass 2: matmul + BN + SiLU fused, bf16 output ----
        out2d = pl.pallas_call(
            _fused_conv_bn_silu_kernel,
            out_shape=jax.ShapeDtypeStruct((Mp, Cp), jnp.bfloat16),
            grid=(num_tiles,),
            in_specs=[
                pl.BlockSpec((tm, Kp), lambda i: (i, 0)),
                w_spec,
                pl.BlockSpec((1, Cp), lambda i: (0, 0)),
                pl.BlockSpec((1, Cp), lambda i: (0, 0)),
            ],
            out_specs=pl.BlockSpec((tm, Cp), lambda i: (i, 0)),
            compiler_params=cparams,
            cost_estimate=pl.CostEstimate(
                flops=2 * Mp * Kp * Cp + 5 * Mp * Cp,
                transcendentals=2 * Mp * Cp,
                bytes_accessed=Mp * Kp * 2 + Kp * Cp * 2 + Mp * Cp * 2 + 2 * Cp * 4),
        )(p, w, scale, shift)
    else:
        # ---- Pass 2: BN + SiLU over large tiles, bf16 output ----
        tm2 = min(2048, Mp)
        if Mp // tm2 < 2 and Mp > 16:
            tm2 = _round_up(pl.cdiv(Mp, 2), 16)
        grid2 = pl.cdiv(Mp, tm2)
        out2d = pl.pallas_call(
            _bn_silu_kernel,
            out_shape=jax.ShapeDtypeStruct((Mp, Cp), jnp.bfloat16),
            grid=(grid2,),
            in_specs=[
                pl.BlockSpec((tm2, Cp), lambda i: (i, 0)),
                pl.BlockSpec((1, Cp), lambda i: (0, 0)),
                pl.BlockSpec((1, Cp), lambda i: (0, 0)),
            ],
            out_specs=pl.BlockSpec((tm2, Cp), lambda i: (i, 0)),
            compiler_params=cparams,
            cost_estimate=pl.CostEstimate(
                flops=5 * Mp * Cp, transcendentals=2 * Mp * Cp,
                bytes_accessed=Mp * Cp * 2 + Mp * Cp * 2 + 2 * Cp * 4),
        )(conv, scale, shift)

    # Slice + layout change done on the bf16 :Cout slice only; cast at the end.
    out = out2d[:M, :Cout].reshape(N, OH, OW, Cout)
    out = jnp.transpose(out, (0, 3, 1, 2))                  # back to NCHW
    return out.astype(out_dtype)


# ----------------------------- reference & test -----------------------------

def _reference(x, w, b, gamma, beta, stride, padding):
    conv = jax.lax.conv_general_dilated(
        x, w, window_strides=(stride, stride),
        padding=[(padding, padding), (padding, padding)],
        dimension_numbers=("NCHW", "OIHW", "NCHW"))
    conv = conv + b.reshape(1, -1, 1, 1)
    mean = jnp.mean(conv, axis=(0, 2, 3), keepdims=True)
    var = jnp.mean((conv - mean) ** 2, axis=(0, 2, 3), keepdims=True)
    y = (gamma.reshape(1, -1, 1, 1) * (conv - mean) * jax.lax.rsqrt(var + BN_EPS)
         + beta.reshape(1, -1, 1, 1))
    return y * jax.nn.sigmoid(y)


def _make_params(key, in_ch, out_ch, ksize):
    k1, k2, k3, k4 = jax.random.split(key, 4)
    fan_in = in_ch * ksize * ksize
    bound = 1.0 / (fan_in ** 0.5)
    weight = jax.random.uniform(k1, (out_ch, in_ch, ksize, ksize), jnp.float32, -bound, bound)
    bias = jax.random.uniform(k2, (out_ch,), jnp.float32, -bound, bound)
    gamma = jnp.ones((out_ch,), jnp.float32) + 0.1 * jax.random.normal(k3, (out_ch,), jnp.float32)
    beta = 0.1 * jax.random.normal(k4, (out_ch,), jnp.float32)
    return weight, bias, gamma, beta


if __name__ == "__main__":
    key = jax.random.PRNGKey(0)
    kx1, kp1, kx2, kp2 = jax.random.split(key, 4)

    # Case 1 — small Cin*K*K (Kp < 2*Cp) -> exercises the fused (recompute) scheme.
    x1 = jax.random.normal(kx1, (2, 4, 16, 16), jnp.float32)
    w1, b1, g1, be1 = _make_params(kp1, 4, 8, 3)
    y1 = cbs_forward(x1, w1, b1, g1, be1, stride=1, padding=1)
    jax.block_until_ready(y1)
    assert y1.shape == (2, 8, 16, 16)
    assert bool(jnp.isfinite(y1).all())
    r1 = _reference(x1, w1, b1, g1, be1, 1, 1)
    assert float(jnp.max(jnp.abs(y1 - r1))) < 0.1

    # Case 2 — larger Cin*K*K (Kp >= 2*Cp) -> exercises the stored-conv scheme.
    x2 = jax.random.normal(kx2, (2, 16, 16, 16), jnp.float32)
    w2, b2, g2, be2 = _make_params(kp2, 16, 8, 3)
    y2 = cbs_forward(x2, w2, b2, g2, be2, stride=2, padding=1)
    jax.block_until_ready(y2)
    assert y2.shape == (2, 8, 8, 8)
    assert bool(jnp.isfinite(y2).all())
    r2 = _reference(x2, w2, b2, g2, be2, 2, 1)
    assert float(jnp.max(jnp.abs(y2 - r2))) < 0.1

    print("KERNEL_OK")
</pallas_src>

<mosaic_0001>
module attributes {stable_mosaic.version = 11 : i64} {
  func.func @_stats_only_kernel(%arg0: i32, %arg1: memref<256x128xbf16, #tpu.memory_space<vmem>>, %arg2: memref<128x128xbf16, #tpu.memory_space<vmem>>, %arg3: memref<1x1x128xf32, #tpu.memory_space<vmem>>, %arg4: memref<1x1x128xf32, #tpu.memory_space<vmem>>) attributes {dimension_semantics = [#tpu.dimension_semantics<parallel>], iteration_bounds = array<i64: 2>, scalar_prefetch = 0 : i64, scratch_operands = 0 : i64, tpu.core_type = #tpu.core_type<tc>, window_params = [{transform_indices = @transform_0, window_bounds = array<i64: 256, 128>}, {pipeline_mode = #tpu.pipeline_mode<synchronous>, transform_indices = @transform_1, window_bounds = array<i64: 128, 128>}, {transform_indices = @transform_2, window_bounds = array<i64: 1, 1, 128>}, {transform_indices = @transform_3, window_bounds = array<i64: 1, 1, 128>}]} {
    %c0 = arith.constant 0 : index
    %c0_0 = arith.constant 0 : index
    %0 = vector.load %arg1[%c0, %c0_0] : memref<256x128xbf16, #tpu.memory_space<vmem>>, vector<256x128xbf16>
    %c0_1 = arith.constant 0 : index
    %c0_2 = arith.constant 0 : index
    %1 = vector.load %arg2[%c0_1, %c0_2] : memref<128x128xbf16, #tpu.memory_space<vmem>>, vector<128x128xbf16>
    %cst = arith.constant dense<0.000000e+00> : vector<256x128xf32>
    %2 = tpu.matmul %0, %1, %cst {dimension_numbers = #tpu.dot_dimension_numbers<[1], [0], [0], [1], [0, 0, 1, 1], [], []>} : vector<256x128xbf16>, vector<128x128xbf16>, vector<256x128xf32> -> vector<256x128xf32>
    %cst_3 = arith.constant dense<0.000000e+00> : vector<128xf32>
    %3 = vector.multi_reduction <add>, %2, %cst_3 [0] : vector<256x128xf32> to vector<128xf32>
    %4 = vector.shape_cast %3 : vector<128xf32> to vector<1x1x128xf32>
    %c0_4 = arith.constant 0 : index
    %c0_5 = arith.constant 0 : index
    %c0_6 = arith.constant 0 : index
    %5 = vector.load %arg3[%c0_4, %c0_5, %c0_6] : memref<1x1x128xf32, #tpu.memory_space<vmem>>, vector<1x1x128xf32>
    tpu.vector_store %arg3[%c0_4, %c0_5, %c0_6], %4 {strides = array<i32>} : memref<1x1x128xf32, #tpu.memory_space<vmem>>, vector<1x1x128xf32>,
    %6 = arith.mulf %2, %2 : vector<256x128xf32>
    %cst_7 = arith.constant dense<0.000000e+00> : vector<128xf32>
    %7 = vector.multi_reduction <add>, %6, %cst_7 [0] : vector<256x128xf32> to vector<128xf32>
    %8 = vector.shape_cast %7 : vector<128xf32> to vector<1x1x128xf32>
    %c0_8 = arith.constant 0 : index
    %c0_9 = arith.constant 0 : index
    %c0_10 = arith.constant 0 : index
    %9 = vector.load %arg4[%c0_8, %c0_9, %c0_10] : memref<1x1x128xf32, #tpu.memory_space<vmem>>, vector<1x1x128xf32>
    tpu.vector_store %arg4[%c0_8, %c0_9, %c0_10], %8 {strides = array<i32>} : memref<1x1x128xf32, #tpu.memory_space<vmem>>, vector<1x1x128xf32>,
    return
  }
  func.func @transform_0(%arg0: i32) -> (i32, i32) {
    %c0_i32 = arith.constant 0 : i32
    %c0_i32_0 = arith.constant 0 : i32
    return %arg0, %c0_i32 : i32, i32
  }
  func.func @transform_1(%arg0: i32) -> (i32, i32) {
    %c0_i32 = arith.constant 0 : i32
    %c0_i32_0 = arith.constant 0 : i32
    %c0_i32_1 = arith.constant 0 : i32
    return %c0_i32, %c0_i32_0 : i32, i32
  }
  func.func @transform_2(%arg0: i32) -> (i32, i32, i32) {
    %c0_i32 = arith.constant 0 : i32
    %c0_i32_0 = arith.constant 0 : i32
    %c0_i32_1 = arith.constant 0 : i32
    return %arg0, %c0_i32, %c0_i32_0 : i32, i32, i32
  }
  func.func @transform_3(%arg0: i32) -> (i32, i32, i32) {
    %c0_i32 = arith.constant 0 : i32
    %c0_i32_0 = arith.constant 0 : i32
    %c0_i32_1 = arith.constant 0 : i32
    return %arg0, %c0_i32, %c0_i32_0 : i32, i32, i32
  }
}

</mosaic_0001>

<bundles_post_ra>
// kernel: tpu_custom_call.1
= control target key start
LH: loop header
LB: loop body
LE: loop exit
PB: predicated region body
PF: predicated region fallthrough
CT: control target
= control target key end

     0   :  { %9 = vsyncpa [#allocation3], 0  ;;  %s1521_s0 = inlined_call_operand.hbm [shape: bf16[512,128], index: 0, kind: input, shape index: {}]   ;;  %s1522_s1 = inlined_call_operand.hbm [shape: bf16[128,128], index: 1, kind: input, shape index: {}]   ;;  %s1523_s2 = inlined_call_operand.hbm [shape: f32[2,1,128], index: 2, kind: output, shape index: {0}]   ;;  %s1524_s3 = inlined_call_operand.hbm [shape: f32[2,1,128], index: 3, kind: output, shape index: {1}]  }
   0x1   :  { %11 = vsyncpa [#allocation3 + $0x1], 0 }
   0x2   :  { %12 = vsyncpa [#allocation6], 0 }
   0x3   :  { %13 = vsyncpa [#allocation4], 0 }
   0x4   :  { %15 = vsyncpa [#allocation4 + $0x1], 0 }
   0x5   :  { %16 = vsyncpa [#allocation9], 0 }
   0x6   :  { %18 = vsyncpa [#allocation9 + $0x1], 0  ;;  %s1213_s12 = smov 0   ;;  %s1215_s13 = smov 0  }
   0x7   :  { %s1217_s14 = smov 0   ;;  %s1219_s15 = smov 0  }
   0x8 LB: > { %s1234_s16 = sadd.s32 4294967295, %s1185_s15   ;;  %s810_s17 = sadd.s32 4294967294, %s1185_s15   ;;  %s1185_s15 = sphi %s1219_s15, %s1544_s15   ;;  %s1181_s14 = sphi %s1217_s14, %s1543_s14   ;;  %s1177_s13 = sphi %s1215_s13, %s1542_s13   ;;  %s1173_s12 = sphi %s1213_s12, %s1541_s12  }
   0x9   : > { %p44_p0 = scmp.ne.s32.totalorder %s1177_s13, %s1173_s12  ;;  %p1525_p1 = scmp.eq.s32.totalorder %s1234_s16, 0 }
   0xa   : > { %p95_p3 = scmp.eq.s32.totalorder %s810_s17, 1  ;;  %p811_p5 = scmp.ge.s32.totalorder %s1185_s15, 1 }
   0xb   : > { %p1243_p4 = por %p1525_p1, %p44_p0  ;;  %p128_p7 = scmp.lt.s32.totalorder %s1185_s15, 3 }
   0xc   : > { %p1248_p6 = por %p95_p3, %p44_p0  ;;  %s1187_s21 = smov [#allocation5]  }
   0xd   : > { %s1528_s18 = scalar_select %p1243_p4, 1, 0 }
   0xe   : > { %s1529_s19 = scalar_select %p1248_p6, 1, 0 }
   0xf   : > { %p1253_p8 = pnand %p811_p5, %p128_p7  ;;  %s140_s22 = sshll.u32 %s1187_s21, 4  ;;  %s1257_s22 = int_to_ptr.vmem [resolvable:$true] %s140_s22 }
  0x10   : > { %s1269_s24 = sadd.s32 1, %s1185_s15   ;;  %s31_s25 = sadd.s32 1, %s1181_s14 }
  0x11   : > { %s1530_s20 = scalar_select %p1253_p8, 1, 0 }
  0x12   : > { %p947_p9 = pneg %p1253_p8  ;;  %s28_s26 = ssub.s32 %s1185_s15, %s1269_s24 }
  0x13   : > { %s1025_s29 = scalar_lea.hbm %s1522_s1, 1024 }
  0x14   : > { %p1264_p11 = pnand %p947_p9, %p1525_p1  ;;  %p1026_p12 = scmp.ne.s32.totalorder %s1522_s1, %s1025_s29 }
  0x15   : > { %p1032_p5 = scmp.lt.u32.totalorder %s1025_s29, %s1522_s1 }
  0x16   : > { %p1027_p13 = pneg %p1264_p11 }
  0x18   : > { %p1028_p0 = pnand %p1027_p13, %p1026_p12 }
  0x1a   : > { %p1029_p3 = pneg %p1028_p0 }
  0x1c   : > { %p1034_p7 = pnand %p1032_p5, %p1029_p3 }
  0x1e   : > { %1037 = shalt.err (!%p1034_p7)
}
  0x1f   : > { %s1038_s7 = scalar_lea.vmem %s1257_s22, 1024  ;;  %p1046_p2 = scmp.lt.s32.totalorder %s1257_s22, %s1257_s22 }
  0x20   : > { %p1039_p9 = scmp.ne.s32.totalorder %s1257_s22, %s1038_s7  ;;  %p1047_p6 = scmp.lt.s32.totalorder %s1038_s7, %s1038_s7 }
  0x22   : > { %p1041_p10 = pnand %p1039_p9, %p1027_p13  ;;  %p1048_p4 = por %p1047_p6, %p1046_p2 }
  0x24   : > { %p1042_p1 = pneg %p1041_p10 }
  0x26   : > { %p1049_p8 = pnand %p1048_p4, %p1042_p1 }
  0x28   : > { %1052 = shalt.err (!%p1049_p8)
}
  0x29   : > { %s1188_s8 = smov 64   ;;  %s1189_s9 = smov 4  }
  0x2a   : > { %950 = dma.hbm_to_vmem [thread:$0]  (!%p1264_p11), %s1522_s1, 1024, %s1257_s22, [#allocation6], %s1188_s8, %s1188_s8, %s1189_s9  }
  0x2b   : > { %p29_p1 = scmp.eq.s32.totalorder %s28_s26, 0  ;;  %p38_p2 = scmp.ne.s32.totalorder %s1181_s14, %s1177_s13 }
  0x2c   : > { %p39_p4 = scmp.eq.s32.totalorder %s1185_s15, 0  ;;  %p963_p6 = scmp.lt.s32.totalorder %s1185_s15, 2 }
  0x2d   : > { %s1303_s17 = scalar_select %p29_p1, %s1181_s14, %s31_s25  }
  0x2e   : > { %p40_p8 = por %p39_p4, %p38_p2  ;;  %p1532_p10 = scmp.eq.s32.totalorder %s1234_s16, 1 }
  0x2f   : > { %s154_s23 = sand.u32 1, %s1181_s14   ;;  %s848_s27 = sshll.u32 %s1185_s15, 11 }
  0x30   : > { %p1307_p12 = por %p1532_p10, %p38_p2  ;;  %s814_s28 = sshll.u32 %s154_s23, 7 }
  0x31   : > { %s1316_s4 = scalar_lea.hbm %s1521_s0, %s848_s27  ;;  %s158_s22 = scalar_lea.vmem [#allocation2], %s814_s28 }
  0x32   : > { %s165_s25 = sshll.u32 %s158_s22, 4  ;;  %p1318_p11 = pnand %p963_p6, %p40_p8  ;;  %s1322_s25 = int_to_ptr.vmem [resolvable:$true] %s165_s25 }
  0x33   : > { %s1324_s5 = scalar_lea.sflag [#allocation3], %s154_s23  ;;  %s1053_s6 = scalar_lea.hbm %s1316_s4, 2048 }
  0x34   : > { %p1054_p13 = scmp.ne.s32.totalorder %s1316_s4, %s1053_s6  ;;  %p1055_p0 = pneg %p1318_p11 }
  0x35   : > { %s1058_s11 = scalar_lea.hbm %s1521_s0, 4096  ;;  %p1059_p7 = scmp.lt.u32.totalorder %s1316_s4, %s1521_s0 }
  0x36   : > { %p1056_p3 = pnand %p1055_p0, %p1054_p13  ;;  %p1060_p9 = scmp.lt.u32.totalorder %s1058_s11, %s1053_s6 }
  0x37   : > { %p1062_p2 = scmp.lt.u32.totalorder %s1053_s6, %s1316_s4 }
  0x38   : > { %p1057_p5 = pneg %p1056_p3  ;;  %p1061_p1 = por %p1060_p9, %p1059_p7 }
  0x3a   : > { %p1063_p4 = por %p1062_p2, %p1061_p1 }
  0x3c   : > { %p1064_p6 = pnand %p1063_p4, %p1057_p5 }
  0x3e   : > { %1067 = shalt.err (!%p1064_p6)
}
  0x3f   : > { %s1068_s23 = scalar_lea.vmem %s1322_s25, 2048  ;;  %s1190_s29 = smov [#allocation2]  }
  0x40   : > { %p1069_p8 = scmp.ne.s32.totalorder %s1322_s25, %s1068_s23  ;;  %s1073_s30 = sshll.u32 %s1190_s29, 4  ;;  %s1074_s30 = int_to_ptr.vmem [resolvable:$false] %s1073_s30 }
  0x41   : > { %s1075_s22 = scalar_lea.vmem %s1074_s30, 4096  ;;  %p1076_p3 = scmp.lt.s32.totalorder %s1322_s25, %s1074_s30 }
  0x42   : > { %p1071_p10 = pnand %p1069_p8, %p1055_p0  ;;  %p1077_p7 = scmp.lt.s32.totalorder %s1075_s22, %s1068_s23 }
  0x44   : > { %p1072_p13 = pneg %p1071_p10  ;;  %p1078_p9 = por %p1077_p7, %p1076_p3 }
  0x46   : > { %p1079_p1 = pnand %p1078_p9, %p1072_p13 }
  0x48   : > { %1082 = shalt.err (!%p1079_p1)
}
  0x49   : > { %954 = dma.hbm_to_vmem [thread:$0]  (!%p1318_p11), %s1316_s4, 2048, %s1322_s25, %s1324_s5, %s1188_s8, %s1188_s8, %s1189_s9  }
  0x4a   : > { %p1535_p0 = scmp.ne.s32.totalorder %s1530_s20, 0 }
  0x4b   : > { %s1358_s6 = sand.u32 (!%p1535_p0), 1, %s1177_s13   ;;  %p1536_p5 = scmp.ne.s32.totalorder (!%p1535_p0), %s1528_s18, 0 }
  0x4c   : > { %177 = sbr.rel (%p1535_p0) target bundleno = 446 (0x1be), region = 28  ;;  %s818_s7 = sshll.u32 (!%p1535_p0), %s1358_s6, 7 }
  0x4d   : > { %s180_s10 = scalar_lea.sflag (!%p1535_p0), [#allocation3], %s1358_s6  ;;  %s1362_s11 = scalar_lea.vmem (!%p1535_p0), [#allocation2], %s818_s7 }
  0x53   : > { %1156 = dma.done.wait (%p1536_p5), %s180_s10, 2048  }
  0x54   : > { %1158 = vsyncadd (%p1536_p5), %s180_s10, 4294965248  ;;  %p1537_p11 = scmp.eq.s32.totalorder %s1234_s16, 0 }
  0x56   : > { %1160 = dma.done.wait (%p1537_p11), [#allocation6], 1024   ;;  %p1538_p2 = pmov %p1537_p11 }
  0x57   : > { %v1001_v0 = vld [vmem:[#allocation5] sm:$0xff]   ;;  %v1002_v1 = vld [vmem:[#allocation5 + $0x8] sm:$0xff]   ;;  %v1003_v2 = vld [vmem:[#allocation5 + $0x10] sm:$0xff]   ;;  %s844_s18 = sshll.u32 %s1234_s16, 4  ;;  %s206_s20 = scalar_lea.vmem [#allocation7], %s1358_s6 }
  0x58   : > { %1162 = vsyncadd (%p1538_p2), [#allocation6], 4294966272  ;;  %873 = vmatprep.subr.bf16.mxu0 %v1001_v0  ;;  %921 = vmatprep.subr.bf16.mxu1 %v1001_v0  ;;  %v1004_v3 = vld [vmem:[#allocation5 + $0x18] sm:$0xff]   ;;  %v1009_v4 = vld [vmem:[%s1362_s11] sm:$0xff]   ;;  %s693_s8 = sshll.u32 %s206_s20, 4  ;;  %s212_s9 = scalar_lea.vmem [#allocation8], %s1358_s6  ;;  %s1448_s8 = int_to_ptr.vmem [resolvable:$true] %s693_s8 }
  0x59   : > { %874 = vmatpush3.bf16.msra.mxu0 %v1001_v0  ;;  %929 = vmatpush3.bf16.msra.mxu1 %v1001_v0  ;;  %v1005_v5 = vld [vmem:[#allocation5 + $0x20] sm:$0xff]   ;;  %v1006_v6 = vld [vmem:[#allocation5 + $0x28] sm:$0xff]   ;;  %v1007_v8 = vld [vmem:[#allocation5 + $0x30] sm:$0xff]   ;;  %s706_s4 = sshll.u32 %s212_s9, 4  ;;  %s1446_s5 = scalar_lea.hbm %s1523_s2, %s844_s18  ;;  %s1455_s4 = int_to_ptr.vmem [resolvable:$true] %s706_s4 }
  0x5a   : > { %875 = vmatprep.subr.bf16.mxu0 %v1002_v1  ;;  %922 = vmatprep.subr.bf16.mxu1 %v1002_v1  ;;  %v1017_v7 = vld [vmem:[%s1362_s11 + $0x40] sm:$0xff]   ;;  %v1008_v9 = vld [vmem:[#allocation5 + $0x38] sm:$0xff]   ;;  %v1010_v10 = vld [vmem:[%s1362_s11 + $0x8] sm:$0xff]   ;;  %s1453_s28 = scalar_lea.hbm %s1524_s3, %s844_s18  ;;  %s677_s23 = scalar_lea.sflag [#allocation4], %s1358_s6 }
  0x5b   : > { %889 = vmatprep.mubr.bf16.mxu0 %v1009_v4  ;;  %905 = vmatprep.mubr.bf16.mxu1 %v1017_v7  ;;  %v1018_v11 = vld [vmem:[%s1362_s11 + $0x48] sm:$0xff]   ;;  %v1011_v12 = vld [vmem:[%s1362_s11 + $0x10] sm:$0xff]   ;;  %v1012_v14 = vld [vmem:[%s1362_s11 + $0x18] sm:$0xff]   ;;  %s1083_s29 = scalar_lea.vmem %s1448_s8, 16  ;;  %s1191_s30 = smov [#allocation7]  }
  0x5c   : > { %v1019_v13 = vld [vmem:[%s1362_s11 + $0x50] sm:$0xff]   ;;  %v1020_v15 = vld [vmem:[%s1362_s11 + $0x58] sm:$0xff]   ;;  %v1013_v16 = vld [vmem:[%s1362_s11 + $0x20] sm:$0xff]   ;;  %p1084_p4 = scmp.ne.s32.totalorder %s1448_s8, %s1083_s29  ;;  %s1087_s22 = sshll.u32 %s1191_s30, 4  ;;  %s1088_s22 = int_to_ptr.vmem [resolvable:$false] %s1087_s22 }
  0x5d   : > { %876 = vmatpush3.bf16.msra.mxu0 %v1002_v1  ;;  %930 = vmatpush3.bf16.msra.mxu1 %v1002_v1  ;;  %v1021_v17 = vld [vmem:[%s1362_s11 + $0x60] sm:$0xff]   ;;  %v1014_v18 = vld [vmem:[%s1362_s11 + $0x28] sm:$0xff]   ;;  %v1015_v20 = vld [vmem:[%s1362_s11 + $0x30] sm:$0xff]   ;;  %s1089_s7 = scalar_lea.vmem %s1088_s22, 32  ;;  %p1090_p10 = scmp.lt.s32.totalorder %s1448_s8, %s1088_s22 }
  0x5e   : > { %877 = vmatprep.subr.bf16.mxu0 %v1003_v2  ;;  %923 = vmatprep.subr.bf16.mxu1 %v1003_v2  ;;  %v1022_v19 = vld [vmem:[%s1362_s11 + $0x68] sm:$0xff]   ;;  %v1023_v21 = vld [vmem:[%s1362_s11 + $0x70] sm:$0xff]   ;;  %v1016_v22 = vld [vmem:[%s1362_s11 + $0x38] sm:$0xff]   ;;  %p1085_p6 = pnand %p1084_p4, %p1307_p12  ;;  %p1091_p13 = scmp.lt.s32.totalorder %s1089_s7, %s1083_s29 }
  0x5f   : > { %v1024_v23 = vld [vmem:[%s1362_s11 + $0x78] sm:$0xff]  }
  0x60   : > { %p1086_p8 = pneg %p1085_p6  ;;  %p1092_p3 = por %p1091_p13, %p1090_p10 }
  0x61   : > { %878 = vmatpush3.bf16.msra.mxu0 %v1003_v2  ;;  %931 = vmatpush3.bf16.msra.mxu1 %v1003_v2 }
  0x62   : > { %879 = vmatprep.subr.bf16.mxu0 %v1004_v3  ;;  %924 = vmatprep.subr.bf16.mxu1 %v1004_v3  ;;  %p1093_p7 = pnand %p1092_p3, %p1086_p8 }
  0x65   : > { %880 = vmatpush3.bf16.msra.mxu0 %v1004_v3  ;;  %932 = vmatpush3.bf16.msra.mxu1 %v1004_v3 }
  0x66   : > { %881 = vmatprep.subr.bf16.mxu0 %v1005_v5  ;;  %925 = vmatprep.subr.bf16.mxu1 %v1005_v5 }
  0x69   : > { %882 = vmatpush3.bf16.msra.mxu0 %v1005_v5  ;;  %933 = vmatpush3.bf16.msra.mxu1 %v1005_v5 }
  0x6a   : > { %883 = vmatprep.subr.bf16.mxu0 %v1006_v6  ;;  %926 = vmatprep.subr.bf16.mxu1 %v1006_v6 }
  0x6d   : > { %884 = vmatpush3.bf16.msra.mxu0 %v1006_v6  ;;  %934 = vmatpush3.bf16.msra.mxu1 %v1006_v6 }
  0x6e   : > { %885 = vmatprep.subr.bf16.mxu0 %v1007_v8  ;;  %927 = vmatprep.subr.bf16.mxu1 %v1007_v8 }
  0x71   : > { %886 = vmatpush3.bf16.msra.mxu0 %v1007_v8  ;;  %935 = vmatpush3.bf16.msra.mxu1 %v1007_v8 }
  0x72   : > { %887 = vmatprep.subr.bf16.mxu0 %v1008_v9  ;;  %928 = vmatprep.subr.bf16.mxu1 %v1008_v9 }
  0x75   : > { %888 = vmatpush3.bf16.msra.mxu0 %v1008_v9  ;;  %936 = vmatpush3.bf16.msra.mxu1 %v1008_v9 }
  0x78   : > { %890 = vmatmul.mubr.bf16.vlgmr.msra.gmra.mrb[0].mxu0 %v1010_v10  ;;  %906 = vmatmul.mubr.bf16.vlgmr.msra.gmra.mrb[0].mxu1 %v1018_v11 }
  0x79   : > { %893 = vmatprep.mubr.bf16.mxu0 %v1011_v12  ;;  %909 = vmatprep.mubr.bf16.mxu1 %v1019_v13 }
  0x80   : > { %894 = vmatmul.mubr.bf16.gmra.mrb[4].mxu0 %v1012_v14  ;;  %910 = vmatmul.mubr.bf16.gmra.mrb[4].mxu1 %v1020_v15 }
  0x81   : > { %897 = vmatprep.mubr.bf16.mxu0 %v1013_v16  ;;  %913 = vmatprep.mubr.bf16.mxu1 %v1021_v17 }
  0x88   : > { %898 = vmatmul.mubr.bf16.gmra.mrb[8].mxu0 %v1014_v18  ;;  %914 = vmatmul.mubr.bf16.gmra.mrb[8].mxu1 %v1022_v19 }
  0x89   : > { %901 = vmatprep.mubr.bf16.mxu0 %v1015_v20  ;;  %917 = vmatprep.mubr.bf16.mxu1 %v1023_v21 }
  0x90   : > { %902 = vmatmul.mubr.bf16.gmra.mrb[12].mxu0 %v1016_v22  ;;  %918 = vmatmul.mubr.bf16.gmra.mrb[12].mxu1 %v1024_v23 }
 0x14b   : > { %v891_v24 = vpop.f32.mrb[0].mxu0  ;;  %v1388_v25 = vpop.f32.mrb[0].mxu1 }
 0x14c   : > { %v441_v26 = vpop.f32.mrb[1].mxu0  ;;  %v1390_v27 = vpop.f32.mrb[1].mxu1  ;;  %v608_v35 = vmul.f32 %v891_v24, %v891_v24 }
 0x14d   : > { %v892_v28 = vpop.f32.mrb[2].mxu0  ;;  %v1392_v29 = vpop.f32.mrb[2].mxu1  ;;  %v606_v32 = vmul.f32 %v441_v26, %v441_v26 }
 0x14e   : > { %v444_v30 = vpop.f32.mrb[3].mxu0  ;;  %v1394_v31 = vpop.f32.mrb[3].mxu1  ;;  %v609_v38 = vmul.f32 %v892_v28, %v892_v28 }
 0x14f   : > { %v568_v33 = vadd.f32 %v444_v30, %v441_v26  ;;  %v607_v34 = vmul.f32 %v444_v30, %v444_v30 }
 0x151   : > { %v569_v36 = vadd.f32 %v891_v24, %v568_v33  ;;  %v638_v37 = vadd.f32 %v607_v34, %v606_v32 }
 0x153   : > { %v639_v39 = vadd.f32 %v638_v37, %v608_v35  ;;  %v895_v40 = vpop.f32.mrb[4].mxu0  ;;  %v570_v41 = vadd.f32 %v892_v28, %v569_v36  ;;  %v1396_v42 = vpop.f32.mrb[4].mxu1 }
 0x154   : > { %v457_v43 = vpop.f32.mrb[5].mxu0  ;;  %v1398_v44 = vpop.f32.mrb[5].mxu1  ;;  %v612_v55 = vmul.f32 %v895_v40, %v895_v40 }
 0x155   : > { %v571_v45 = vadd.f32 %v570_v41, %v457_v43  ;;  %v610_v46 = vmul.f32 %v457_v43, %v457_v43  ;;  %v640_v47 = vadd.f32 %v639_v39, %v609_v38  ;;  %v896_v48 = vpop.f32.mrb[6].mxu0  ;;  %v1400_v49 = vpop.f32.mrb[6].mxu1  ;;  %v622_v41 = vmul.f32 %v1390_v27, %v1390_v27 }
 0x156   : > { %v460_v50 = vpop.f32.mrb[7].mxu0  ;;  %v1402_v51 = vpop.f32.mrb[7].mxu1  ;;  %v613_v58 = vmul.f32 %v896_v48, %v896_v48 }
 0x157   : > { %v641_v52 = vadd.f32 %v640_v47, %v610_v46  ;;  %v572_v53 = vadd.f32 %v571_v45, %v460_v50  ;;  %v611_v54 = vmul.f32 %v460_v50, %v460_v50  ;;  %v624_v50 = vmul.f32 %v1388_v25, %v1388_v25 }
 0x159   : > { %v573_v56 = vadd.f32 %v895_v40, %v572_v53  ;;  %v642_v57 = vadd.f32 %v641_v52, %v611_v54  ;;  %v625_v54 = vmul.f32 %v1392_v29, %v1392_v29 }
 0x15b   : > { %v643_v59 = vadd.f32 %v642_v57, %v612_v55  ;;  %v899_v60 = vpop.f32.mrb[8].mxu0  ;;  %v574_v61 = vadd.f32 %v896_v48, %v573_v56  ;;  %v1404_v62 = vpop.f32.mrb[8].mxu1  ;;  %v623_v48 = vmul.f32 %v1394_v31, %v1394_v31 }
 0x15c   : > { %v473_v63 = vpop.f32.mrb[9].mxu0  ;;  %v537_v0 = vpop.f32.mrb[9].mxu1  ;;  %v616_v11 = vmul.f32 %v899_v60, %v899_v60 }
 0x15d   : > { %v575_v1 = vadd.f32 %v574_v61, %v473_v63  ;;  %v614_v2 = vmul.f32 %v473_v63, %v473_v63  ;;  %v644_v3 = vadd.f32 %v643_v59, %v613_v58  ;;  %v900_v4 = vpop.f32.mrb[10].mxu0  ;;  %v1406_v5 = vpop.f32.mrb[10].mxu1 }
 0x15e   : > { %v476_v6 = vpop.f32.mrb[11].mxu0  ;;  %v540_v7 = vpop.f32.mrb[11].mxu1  ;;  %v617_v14 = vmul.f32 %v900_v4, %v900_v4 }
 0x15f   : > { %v645_v8 = vadd.f32 %v644_v3, %v614_v2  ;;  %v576_v9 = vadd.f32 %v575_v1, %v476_v6  ;;  %v615_v10 = vmul.f32 %v476_v6, %v476_v6 }
 0x161   : > { %v577_v12 = vadd.f32 %v899_v60, %v576_v9  ;;  %v646_v13 = vadd.f32 %v645_v8, %v615_v10  ;;  %v627_v60 = vmul.f32 %v1402_v51, %v1402_v51  ;;  %v631_v9 = vmul.f32 %v540_v7, %v540_v7 }
 0x163   : > { %v647_v15 = vadd.f32 %v646_v13, %v616_v11  ;;  %v903_v16 = vpop.f32.mrb[12].mxu0  ;;  %v578_v17 = vadd.f32 %v900_v4, %v577_v12  ;;  %v919_v18 = vpop.f32.mrb[12].mxu1 }
 0x164   : > { %v489_v19 = vpop.f32.mrb[13].mxu0  ;;  %v553_v20 = vpop.f32.mrb[13].mxu1  ;;  %v620_v35 = vmul.f32 %v903_v16, %v903_v16 }
 0x165   : > { %v579_v21 = vadd.f32 %v578_v17, %v489_v19  ;;  %v618_v22 = vmul.f32 %v489_v19, %v489_v19  ;;  %v648_v23 = vadd.f32 %v647_v15, %v617_v14  ;;  %v904_v24 = vpop.f32.mrb[14].mxu0  ;;  %v920_v26 = vpop.f32.mrb[14].mxu1  ;;  %v634_v14 = vmul.f32 %v553_v20, %v553_v20 }
 0x166   : > { %v492_v28 = vpop.f32.mrb[15].mxu0  ;;  %v556_v30 = vpop.f32.mrb[15].mxu1  ;;  %v621_v38 = vmul.f32 %v904_v24, %v904_v24 }
 0x167   : > { %v649_v32 = vadd.f32 %v648_v23, %v618_v22  ;;  %v580_v33 = vadd.f32 %v579_v21, %v492_v28  ;;  %v619_v34 = vmul.f32 %v492_v28, %v492_v28  ;;  %v635_v17 = vmul.f32 %v556_v30, %v556_v30 }
 0x168   : > { %v637_v22 = vmul.f32 %v920_v26, %v920_v26 }
 0x169   : > { %v581_v36 = vadd.f32 %v903_v16, %v580_v33  ;;  %v650_v37 = vadd.f32 %v649_v32, %v619_v34 }
 0x16b   : > { %v651_v39 = vadd.f32 %v650_v37, %v620_v35  ;;  %v582_v40 = vadd.f32 %v904_v24, %v581_v36 }
 0x16d   : > { %v583_v43 = vadd.f32 %v582_v40, %v1390_v27  ;;  %v652_v45 = vadd.f32 %v651_v39, %v621_v38  ;;  %v626_v27 = vmul.f32 %v1398_v44, %v1398_v44 }
 0x16f   : > { %v653_v46 = vadd.f32 %v652_v45, %v622_v41  ;;  %v584_v47 = vadd.f32 %v583_v43, %v1394_v31 }
 0x171   : > { %v585_v52 = vadd.f32 %v1388_v25, %v584_v47  ;;  %v654_v53 = vadd.f32 %v653_v46, %v623_v48  ;;  %v628_v25 = vmul.f32 %v1396_v42, %v1396_v42 }
 0x173   : > { %v655_v55 = vadd.f32 %v654_v53, %v624_v50  ;;  %v586_v56 = vadd.f32 %v1392_v29, %v585_v52  ;;  %v629_v29 = vmul.f32 %v1400_v49, %v1400_v49 }
 0x175   : > { %v587_v57 = vadd.f32 %v586_v56, %v1398_v44  ;;  %v656_v58 = vadd.f32 %v655_v55, %v625_v54  ;;  %v630_v44 = vmul.f32 %v537_v0, %v537_v0 }
 0x177   : > { %v657_v59 = vadd.f32 %v656_v58, %v626_v27  ;;  %v588_v31 = vadd.f32 %v587_v57, %v1402_v51  ;;  %v632_v51 = vmul.f32 %v1404_v62, %v1404_v62 }
 0x179   : > { %v589_v61 = vadd.f32 %v1396_v42, %v588_v31  ;;  %v658_v63 = vadd.f32 %v657_v59, %v627_v60  ;;  %v633_v42 = vmul.f32 %v1406_v5, %v1406_v5 }
 0x17b   : > { %v659_v1 = vadd.f32 %v658_v63, %v628_v25  ;;  %v590_v2 = vadd.f32 %v1400_v49, %v589_v61 }
 0x17d   : > { %v591_v3 = vadd.f32 %v590_v2, %v537_v0  ;;  %v660_v4 = vadd.f32 %v659_v1, %v629_v29 }
 0x17f   : > { %v661_v6 = vadd.f32 %v660_v4, %v630_v44  ;;  %v592_v8 = vadd.f32 %v591_v3, %v540_v7  ;;  %v636_v7 = vmul.f32 %v919_v18, %v919_v18 }
 0x181   : > { %v593_v10 = vadd.f32 %v1404_v62, %v592_v8  ;;  %v662_v11 = vadd.f32 %v661_v6, %v631_v9 }
 0x183   : > { %v663_v12 = vadd.f32 %v662_v11, %v632_v51  ;;  %v594_v13 = vadd.f32 %v1406_v5, %v593_v10 }
 0x185   : > { %v595_v49 = vadd.f32 %v594_v13, %v553_v20  ;;  %v664_v15 = vadd.f32 %v663_v12, %v633_v42 }
 0x187   : > { %v665_v0 = vadd.f32 %v664_v15, %v634_v14  ;;  %v596_v16 = vadd.f32 %v595_v49, %v556_v30 }
 0x189   : > { %v597_v19 = vadd.f32 %v919_v18, %v596_v16  ;;  %v666_v21 = vadd.f32 %v665_v0, %v635_v17 }
 0x18b   : > { %v598_v62 = vadd.f32 %v920_v26, %v597_v19  ;;  %v667_v23 = vadd.f32 %v666_v21, %v636_v7 }
 0x18d   : > { %v599_v24 = vrot.slane %v598_v62, 4  ;;  %v668_v28 = vadd.f32 %v667_v23, %v637_v22 }
 0x18f   : > { %v600_v32 = vadd.f32 %v599_v24, %v598_v62  ;;  %v669_v5 = vrot.slane %v668_v28, 4 }
 0x191   : > { %v601_v33 = vrot.slane %v600_v32, 2  ;;  %v670_v20 = vadd.f32 %v669_v5, %v668_v28 }
 0x193   : > { %v602_v34 = vadd.f32 %v601_v33, %v600_v32  ;;  %v671_v35 = vrot.slane %v670_v20, 2 }
 0x195   : > { %v603_v18 = vrot.slane %v602_v34, 1  ;;  %v672_v30 = vadd.f32 %v671_v35, %v670_v20 }
 0x197   : > { %v604_v26 = vadd.f32 %v603_v18, %v602_v34  ;;  %v673_v36 = vrot.slane %v672_v30, 1 }
 0x199   : > { %605 = vst [vmem:[%s206_s20] sm:$0x1] %v604_v26  ;;  %v674_v37 = vadd.f32 %v673_v36, %v672_v30 }
 0x19a   : > { %1096 = shalt.err (!%p1093_p7)
}
 0x19b   : > { %s1097_s10 = scalar_lea.hbm %s1446_s5, 16  ;;  %s1101_s20 = scalar_lea.hbm %s1523_s2, 32 }
 0x19c   : > { %p1098_p9 = scmp.ne.s32.totalorder %s1446_s5, %s1097_s10  ;;  %p1102_p5 = scmp.lt.u32.totalorder %s1446_s5, %s1523_s2 }
 0x19d   : > { %p1103_p11 = scmp.lt.u32.totalorder %s1101_s20, %s1097_s10  ;;  %p1105_p4 = scmp.lt.u32.totalorder %s1097_s10, %s1446_s5 }
 0x19e   : > { %p1099_p1 = pnand %p1098_p9, %p1307_p12 }
 0x19f   : > { %p1104_p2 = por %p1103_p11, %p1102_p5 }
 0x1a0   : > { %p1100_p0 = pneg %p1099_p1 }
 0x1a1   : > { %p1106_p6 = por %p1105_p4, %p1104_p2 }
 0x1a3   : > { %p1107_p8 = pnand %p1106_p6, %p1100_p0 }
 0x1a5   : > { %1110 = shalt.err (!%p1107_p8)
}
 0x1a6   : > { %943 = dma.vmem_to_hbm [thread:$0]  (%p1307_p12), %s1448_s8, 16, %s1446_s5, %s677_s23   ;;  %675 = vst [vmem:[%s212_s9] sm:$0x1] %v674_v37 }
 0x1a7   : > { %s681_s16 = scalar_lea.sflag [#allocation9], %s1358_s6  ;;  %s1111_s27 = scalar_lea.vmem %s1455_s4, 16 }
 0x1a8   : > { %p1112_p10 = scmp.ne.s32.totalorder %s1455_s4, %s1111_s27  ;;  %s1192_s29 = smov [#allocation8]  }
 0x1a9   : > { %s1115_s30 = sshll.u32 %s1192_s29, 4  ;;  %s1116_s30 = int_to_ptr.vmem [resolvable:$false] %s1115_s30 }
 0x1aa   : > { %p1113_p13 = pnand %p1112_p10, %p1307_p12  ;;  %s1117_s22 = scalar_lea.vmem %s1116_s30, 32 }
 0x1ab   : > { %p1118_p7 = scmp.lt.s32.totalorder %s1455_s4, %s1116_s30  ;;  %p1119_p9 = scmp.lt.s32.totalorder %s1117_s22, %s1111_s27 }
 0x1ac   : > { %p1114_p3 = pneg %p1113_p13 }
 0x1ad   : > { %p1120_p1 = por %p1119_p9, %p1118_p7 }
 0x1af   : > { %p1121_p0 = pnand %p1120_p1, %p1114_p3 }
 0x1b1   : > { %1124 = shalt.err (!%p1121_p0)
}
 0x1b2   : > { %s1125_s6 = scalar_lea.hbm %s1453_s28, 16  ;;  %s1129_s5 = scalar_lea.hbm %s1524_s3, 32 }
 0x1b3   : > { %p1126_p5 = scmp.ne.s32.totalorder %s1453_s28, %s1125_s6  ;;  %p1130_p4 = scmp.lt.u32.totalorder %s1453_s28, %s1524_s3 }
 0x1b4   : > { %p1131_p6 = scmp.lt.u32.totalorder %s1129_s5, %s1125_s6  ;;  %p1133_p10 = scmp.lt.u32.totalorder %s1125_s6, %s1453_s28 }
 0x1b5   : > { %p1127_p11 = pnand %p1126_p5, %p1307_p12 }
 0x1b6   : > { %p1132_p8 = por %p1131_p6, %p1130_p4 }
 0x1b7   : > { %p1128_p2 = pneg %p1127_p11 }
 0x1b8   : > { %p1134_p13 = por %p1133_p10, %p1132_p8 }
 0x1ba   : > { %p1135_p3 = pnand %p1134_p13, %p1128_p2 }
 0x1bc   : > { %1138 = shalt.err (!%p1135_p3)
}
 0x1bd   : > { %944 = dma.vmem_to_hbm [thread:$0]  (%p1307_p12), %s1455_s4, 16, %s1453_s28, %s681_s16  }
 0x1be PF: > { %s718_s10 = sand.u32 1, %s1173_s12   ;;  %p1539_p7 = scmp.ne.s32.totalorder %s1529_s19, 0 }
 0x1bf   : > { %p1540_p9 = scmp.ge.s32.totalorder %s1185_s15, 2  ;;  %s719_s11 = scalar_lea.sflag [#allocation4], %s718_s10 }
 0x1c1   : > { %p956_p1 = pnand %p1540_p9, %p1539_p7 }
 0x1c3   : > { %1164 = dma.done.wait (!%p956_p1), %s719_s11, 16  }
 0x1c4   : > { %1166 = vsyncadd (!%p956_p1), %s719_s11, 4294967280  ;;  %s727_s18 = scalar_lea.sflag [#allocation9], %s718_s10 }
 0x1c5   : > { %1168 = dma.done.wait (!%p956_p1), %s727_s18, 16  }
 0x1c6   : > { %1170 = vsyncadd (!%p956_p1), %s727_s18, 4294967280  ;;  %p21_p12 = scmp.ge.s32.totalorder %s1269_s24, 4   ;;  %s1541_s12 = smov %s1177_s13 }
 0x1c7   : > { %s1542_s13 = smov %s1181_s14  ;;  %s1543_s14 = smov %s1303_s17 }
 0x1c8   : > { %s1544_s15 = smov %s1269_s24  ;;  %23 = sbr.rel (!%p21_p12) target bundleno = 8 (0x8), region = 94 }
 0x1cf   :  { %731 = vsyncpa [#allocation3], 1 }
 0x1d0   :  { %733 = vsyncpa [#allocation3 + $0x1], 1 }
 0x1d1   :  { %734 = vsyncpa [#allocation6], 1 }
 0x1d2   :  { %735 = vsyncpa [#allocation4], 1 }
 0x1d3   :  { %737 = vsyncpa [#allocation4 + $0x1], 1 }
 0x1d4   :  { %738 = vsyncpa [#allocation9], 1 }
 0x1d5   :  { %740 = vsyncpa [#allocation9 + $0x1], 1 }

</bundles_post_ra>
